<compile_context>
chip_gen: v7x
topology: tpu7x:2x2x1
jax: 0.10.0
libtpu: 0.0.40
codegen_flags: <defaults>
</compile_context>

<pallas_src>
import jax
import jax.numpy as jnp
from jax.experimental import pallas as pl
from jax.experimental.pallas import tpu as pltpu

_LANE = 128
_SUBLANE = 8


def _cdiv(a: int, b: int) -> int:
    return -(-a // b)


def _round_up(a: int, b: int) -> int:
    return _cdiv(a, b) * b


def _pad_tile_bytes(rows: int, cols: int, itemsize: int = 4) -> int:
    """f32 VMEM footprint of a (rows, cols) slab after (8,128) tile padding."""
    return itemsize * _round_up(max(rows, 1), _SUBLANE) * _round_up(max(cols, 1), _LANE)


def _scoped_vmem_limit() -> int:
    """Generation-aware scoped-VMEM target (bytes), conservative fallback."""
    try:
        phys = int(pltpu.get_tpu_info().vmem_capacity_bytes)
    except Exception:
        phys = 64 * 1024 * 1024            # v7x physical (smallest generation)
    # Keep ~1/4 headroom for Mosaic internal scratch / pipeline bookkeeping.
    return max(min(3 * phys // 4, 112 * 1024 * 1024), 16 * 1024 * 1024)


def _interp_matrix(out_size: int, in_size: int) -> jnp.ndarray:
    """Bilinear interpolation matrix matching F.interpolate(mode='bilinear',
    align_corners=False). Shape (out_size, in_size), float32."""
    o = jnp.arange(out_size, dtype=jnp.float32)
    scale = in_size / out_size
    src = (o + 0.5) * scale - 0.5
    src = jnp.maximum(src, 0.0)
    i0 = jnp.minimum(jnp.floor(src).astype(jnp.int32), in_size - 1)
    i1 = jnp.minimum(i0 + 1, in_size - 1)
    lam = jnp.clip(src - i0.astype(jnp.float32), 0.0, 1.0)
    w = (jax.nn.one_hot(i0, in_size, dtype=jnp.float32) * (1.0 - lam)[:, None]
         + jax.nn.one_hot(i1, in_size, dtype=jnp.float32) * lam[:, None])
    return w


# --------------------------------------------------------------------------- #
# Dense fast path (small frames): one lane-dense matmul does every resize.
# --------------------------------------------------------------------------- #
def _make_dense_kernel(num_scales, col_offs, hw_sizes):
    def kernel(x_ref, a_ref, *rest):
        r_refs = rest[:num_scales]
        out_refs = rest[num_scales:]

        @pl.when(pl.program_id(1) == 0)
        def _init():
            for o in out_refs:
                o[...] = jnp.zeros_like(o)

        # One lane-dense MXU matmul performs the bilinear resize for ALL scales.
        proj = jnp.dot(x_ref[...], a_ref[...],
                       preferred_element_type=jnp.float32)        # (B, K_cols)
        for s in range(num_scales):
            k = hw_sizes[s]
            sl = proj[:, col_offs[s]:col_offs[s] + k]              # lane-aligned
            diff = jnp.abs(sl - r_refs[s][...])                    # (B, k) VPU
            # Sublane-sum over the plane block; accumulate into the resident
            # output block (written back to HBM only once per p-split).
            out_refs[s][...] += jnp.sum(diff, axis=0, keepdims=True).reshape(1, 1, k)

    return kernel


def _dense_path(obs, recons_in, hw_list, N, H, W, vmem_limit, max_block_planes):
    num_scales = len(hw_list)
    HW = H * W
    hw_sizes = [h * w for (h, w) in hw_list]
    col_pad = [_round_up(k, _LANE) for k in hw_sizes]
    col_offs, off = [], 0
    for cp in col_pad:
        col_offs.append(off)
        off += cp
    K_cols = off

    x = obs.reshape(N, HW)
    recons = [r.astype(jnp.float32).reshape(N, k)
              for r, k in zip(recons_in, hw_sizes)]

    # Dense interp matrix: one lane-aligned column block per scale.
    a_parts = []
    for (h, w), k, cp in zip(hw_list, hw_sizes, col_pad):
        a_s = jnp.kron(_interp_matrix(h, H), _interp_matrix(w, W)).T   # (HW, h*w)
        a_parts.append(jnp.pad(a_s, ((0, 0), (0, cp - k))))
    a_all = jnp.concatenate(a_parts, axis=1)                           # (HW, K_cols)

    # --- (8,128)-padded VMEM footprint per plane of a block ---------------- #
    lane = lambda n: 4 * _round_up(n, _LANE)
    per_plane = (2 * lane(HW)                                # x rows (x2 buffers)
                 + 2 * sum(lane(k) for k in hw_sizes)        # recon rows (x2)
                 + lane(K_cols)                              # proj temporary
                 + sum(lane(k) for k in hw_sizes))           # per-scale diff temps
    const_bytes = (2 * _pad_tile_bytes(HW, K_cols)           # A (double-buffered)
                   + sum(_pad_tile_bytes(1, k) for k in hw_sizes))  # resident outs
    budget = max(vmem_limit // 2 - const_bytes, 8 * per_plane)
    B = max(8, (budget // per_plane // 8) * 8)
    if max_block_planes is not None:
        B = min(B, max(8, (max_block_planes // 8) * 8))
    B = min(B, _round_up(N, 8))

    nb = _cdiv(N, B)
    P = 2 if nb >= 2 else 1            # leading "parallel" split (dual-TC on v7x)
    G = _cdiv(nb, P)
    N_pad = P * G * B                  # zero-padded planes contribute |0-0| = 0

    def pad2(a):
        pad = N_pad - a.shape[0]
        return jnp.pad(a, ((0, pad), (0, 0))) if pad else a

    x = pad2(x)
    recons = [pad2(r) for r in recons]

    kernel = _make_dense_kernel(num_scales, tuple(col_offs), tuple(hw_sizes))

    row_idx = lambda p, g: (p * G + g, 0)
    in_specs = [pl.BlockSpec((B, HW), row_idx),
                pl.BlockSpec((HW, K_cols), lambda p, g: (0, 0))]
    in_specs += [pl.BlockSpec((B, k), row_idx) for k in hw_sizes]

    out_shape = tuple(jax.ShapeDtypeStruct((P, 1, k), jnp.float32) for k in hw_sizes)
    out_specs = tuple(pl.BlockSpec((1, 1, k), lambda p, g: (p, 0, 0))
                      for k in hw_sizes)

    outs = pl.pallas_call(
        kernel,
        out_shape=out_shape,
        grid_spec=pltpu.PrefetchScalarGridSpec(
            num_scalar_prefetch=0,
            grid=(P, G),
            in_specs=in_specs,
            out_specs=out_specs),
        compiler_params=pltpu.CompilerParams(
            dimension_semantics=("parallel", "arbitrary"),
            vmem_limit_bytes=int(vmem_limit)),
    )(x, a_all, *recons)

    total = jnp.float32(0.0)
    for s, k in enumerate(hw_sizes):
        # L1Loss 'mean' over the REAL (unpadded) element count of this scale.
        total = total + jnp.sum(outs[s]) / jnp.float32(N * k)
    return total / num_scales


# --------------------------------------------------------------------------- #
# Separable path (large frames): shared W-contraction, per-scale H-contraction.
# --------------------------------------------------------------------------- #
def _make_sep_kernel(num_scales, B, H, W, hw_list, w_offs, kw_cols):
    def kernel(x_ref, wwt_ref, *rest):
        wh_refs = rest[:num_scales]
        r_refs = rest[num_scales:2 * num_scales]
        out_refs = rest[2 * num_scales:]

        @pl.when(pl.program_id(1) == 0)
        def _init():
            for o in out_refs:
                o[...] = jnp.zeros_like(o)

        x = x_ref[...]                                            # (B, H, W)
        # Single big-M matmul: W-contraction for every scale at once.
        t_all = jnp.dot(x.reshape(B * H, W), wwt_ref[...],
                        preferred_element_type=jnp.float32)        # (B*H, kw_cols)
        t_all = t_all.reshape(B, H, kw_cols)
        for s in range(num_scales):
            h, w = hw_list[s]
            t = t_all[:, :, w_offs[s]:w_offs[s] + w]               # (B, H, w)
            wh = wh_refs[s][...]                                   # (h, H)
            # Batched H-contraction: acceptable here, this path is only taken
            # for large frames where h, H, w are all large.
            whb = jnp.broadcast_to(wh[None], (B, h, H))
            resized = jnp.einsum('bhH,bHw->bhw', whb, t,
                                 preferred_element_type=jnp.float32)
            diff = jnp.abs(resized - r_refs[s][...])               # (B, h, w)
            out_refs[s][...] += jnp.sum(diff, axis=0, keepdims=True)

    return kernel


def _separable_path(obs, recons_in, hw_list, N, H, W, vmem_limit, max_block_planes):
    num_scales = len(hw_list)
    x = obs.reshape(N, H, W)
    recons = [r.astype(jnp.float32).reshape(N, h, w)
              for r, (h, w) in zip(recons_in, hw_list)]

    w_pad = [_round_up(w, _LANE) for (h, w) in hw_list]
    w_offs, off = [], 0
    for cp in w_pad:
        w_offs.append(off)
        off += cp
    kw_cols = off

    whs = [_interp_matrix(h, H) for (h, w) in hw_list]             # (h, H) each
    wwt_parts = [jnp.pad(_interp_matrix(w, W).T, ((0, 0), (0, cp - w)))
                 for (h, w), cp in zip(hw_list, w_pad)]
    wwt_all = jnp.concatenate(wwt_parts, axis=1)                   # (W, kw_cols)

    # (8,128)-padded per-plane footprint (inputs double-buffered, temps single).
    per_plane = (2 * _pad_tile_bytes(H, W)
                 + 2 * sum(_pad_tile_bytes(h, w) for (h, w) in hw_list)
                 + 4 * _round_up(H, _SUBLANE) * kw_cols                 # t_all
                 + sum(_pad_tile_bytes(h, H) for (h, w) in hw_list)     # whb
                 + 2 * sum(_pad_tile_bytes(h, w) for (h, w) in hw_list))  # resized+diff
    const_bytes = (2 * _pad_tile_bytes(W, kw_cols)
                   + 2 * sum(_pad_tile_bytes(h, H) for (h, w) in hw_list)
                   + sum(_pad_tile_bytes(h, w) for (h, w) in hw_list))
    budget = max(vmem_limit // 2 - const_bytes, 8 * per_plane)
    B = max(8, (budget // per_plane // 8) * 8)
    if max_block_planes is not None:
        B = min(B, max(8, (max_block_planes // 8) * 8))
    B = min(B, _round_up(N, 8))

    nb = _cdiv(N, B)
    P = 2 if nb >= 2 else 1
    G = _cdiv(nb, P)
    N_pad = P * G * B

    def pad3(a):
        pad = N_pad - a.shape[0]
        return jnp.pad(a, ((0, pad), (0, 0), (0, 0))) if pad else a

    x = pad3(x)
    recons = [pad3(r) for r in recons]

    kernel = _make_sep_kernel(num_scales, B, H, W, tuple(hw_list),
                              tuple(w_offs), kw_cols)

    plane_idx = lambda p, g: (p * G + g, 0, 0)
    const_idx = lambda p, g: (0, 0)
    in_specs = [pl.BlockSpec((B, H, W), plane_idx),
                pl.BlockSpec((W, kw_cols), const_idx)]
    in_specs += [pl.BlockSpec((h, H), const_idx) for (h, w) in hw_list]
    in_specs += [pl.BlockSpec((B, h, w), plane_idx) for (h, w) in hw_list]

    out_shape = tuple(jax.ShapeDtypeStruct((P, h, w), jnp.float32)
                      for (h, w) in hw_list)
    out_specs = tuple(pl.BlockSpec((1, h, w), lambda p, g: (p, 0, 0))
                      for (h, w) in hw_list)

    outs = pl.pallas_call(
        kernel,
        out_shape=out_shape,
        grid_spec=pltpu.PrefetchScalarGridSpec(
            num_scalar_prefetch=0,
            grid=(P, G),
            in_specs=in_specs,
            out_specs=out_specs),
        compiler_params=pltpu.CompilerParams(
            dimension_semantics=("parallel", "arbitrary"),
            vmem_limit_bytes=int(vmem_limit)),
    )(x, wwt_all, *whs, *recons)

    total = jnp.float32(0.0)
    for s, (h, w) in enumerate(hw_list):
        total = total + jnp.sum(outs[s]) / jnp.float32(N * h * w)
    return total / num_scales


# --------------------------------------------------------------------------- #
# Public entry point.
# --------------------------------------------------------------------------- #
def _multiscale_l1_loss_impl(observations, reconstructed_observations,
                             max_block_planes=None, force_separable=False):
    """observations: (bs, T, 3*stack, H, W)
    reconstructed_observations: list of (bs, T-1, 3, h_i, w_i)
    Returns scalar: mean over scales of L1Loss(resize(obs[:,1:,:3]), recon_i)."""
    obs = observations[:, 1:, :3].astype(jnp.float32)      # (bs, T-1, 3, H, W)
    bs, tm1, c, H, W = obs.shape
    N = bs * tm1 * c

    hw_list = []
    for recon in reconstructed_observations:
        rb, rt, rc, h, w = recon.shape
        assert (rb, rt, rc) == (bs, tm1, c)
        hw_list.append((h, w))

    vmem_limit = _scoped_vmem_limit()

    # Dense-interp fast path if the (H*W, sum_s pad128(h_s*w_s)) matrix
    # (double-buffered) fits a modest slice of scoped VMEM.
    k_cols = sum(_round_up(h * w, _LANE) for (h, w) in hw_list)
    dense_a_bytes = _pad_tile_bytes(H * W, k_cols)
    use_dense = (not force_separable) and (2 * dense_a_bytes <= vmem_limit // 4)

    if use_dense:
        return _dense_path(obs, reconstructed_observations, hw_list, N, H, W,
                           vmem_limit, max_block_planes)
    return _separable_path(obs, reconstructed_observations, hw_list, N, H, W,
                           vmem_limit, max_block_planes)


multiscale_l1_loss = jax.jit(
    _multiscale_l1_loss_impl,
    static_argnames=("max_block_planes", "force_separable"))


def _reference(observations, reconstructed_observations):
    """Pure-JAX reference using the same separable bilinear formulation."""
    obs = observations[:, 1:, :3].astype(jnp.float32)
    bs, tm1, c, H, W = obs.shape
    x = obs.reshape(bs * tm1 * c, H, W)
    total = jnp.float32(0.0)
    for recon in reconstructed_observations:
        h, w = recon.shape[3], recon.shape[4]
        wh = _interp_matrix(h, H)
        ww = _interp_matrix(w, W)
        resized = jnp.einsum('hH,nHW,wW->nhw', wh, x, ww)
        total = total + jnp.mean(
            jnp.abs(resized - recon.reshape(-1, h, w).astype(jnp.float32)))
    return total / len(reconstructed_observations)


if __name__ == "__main__":
    key = jax.random.PRNGKey(0)
    k_obs, k_r0, k_r1 = jax.random.split(key, 3)

    bs, T, stack, H, W = 2, 4, 2, 16, 16
    observations = jax.random.normal(k_obs, (bs, T, 3 * stack, H, W), jnp.float32)
    reconstructions = [
        jax.random.normal(k_r0, (bs, T - 1, 3, 16, 16), jnp.float32),
        jax.random.normal(k_r1, (bs, T - 1, 3, 8, 8), jnp.float32),
    ]

    ref = jax.block_until_ready(_reference(observations, reconstructions))

    # Dense fast path, single plane-block -> grid (1, 1).
    loss = jax.block_until_ready(multiscale_l1_loss(observations, reconstructions))
    assert jnp.allclose(loss, ref, rtol=1e-5, atol=1e-5), (loss, ref)

    # Dense path with forced small plane-blocks -> multi-step grid + 2-way
    # "parallel" split with per-split partial sums.
    loss_tiled = jax.block_until_ready(
        multiscale_l1_loss(observations, reconstructions, max_block_planes=8))
    assert jnp.allclose(loss_tiled, ref, rtol=1e-5, atol=1e-5), (loss_tiled, ref)

    # Separable (large-frame) path exercised at small shapes for correctness.
    loss_sep = jax.block_until_ready(
        multiscale_l1_loss(observations, reconstructions,
                           max_block_planes=8, force_separable=True))
    assert jnp.allclose(loss_sep, ref, rtol=1e-5, atol=1e-5), (loss_sep, ref)

    print("KERNEL_OK")
</pallas_src>

<mosaic_0001>
module attributes {stable_mosaic.version = 11 : i64} {
  func.func @kernel(%arg0: i32, %arg1: i32, %arg2: memref<24x256xf32, #tpu.memory_space<vmem>>, %arg3: memref<256x384xf32, #tpu.memory_space<vmem>>, %arg4: memref<24x256xf32, #tpu.memory_space<vmem>>, %arg5: memref<24x64xf32, #tpu.memory_space<vmem>>, %arg6: memref<1x1x256xf32, #tpu.memory_space<vmem>>, %arg7: memref<1x1x64xf32, #tpu.memory_space<vmem>>) attributes {dimension_semantics = [#tpu.dimension_semantics<parallel>, #tpu.dimension_semantics<arbitrary>], iteration_bounds = array<i64: 1, 1>, scalar_prefetch = 0 : i64, scratch_operands = 0 : i64, tpu.core_type = #tpu.core_type<tc>, window_params = [{transform_indices = @transform_0, window_bounds = array<i64: 24, 256>}, {pipeline_mode = #tpu.pipeline_mode<synchronous>, transform_indices = @transform_1, window_bounds = array<i64: 256, 384>}, {transform_indices = @transform_2, window_bounds = array<i64: 24, 256>}, {transform_indices = @transform_3, window_bounds = array<i64: 24, 64>}, {transform_indices = @transform_4, window_bounds = array<i64: 1, 1, 256>}, {transform_indices = @transform_5, window_bounds = array<i64: 1, 1, 64>}]} {
    %c0_i32 = arith.constant 0 : i32
    %0 = arith.cmpi eq, %arg1, %c0_i32 : i32
    %1 = arith.extui %0 : i1 to i32
    %c0_i32_0 = arith.constant 0 : i32
    %2 = arith.cmpi ne, %1, %c0_i32_0 : i32
    scf.if %2 {
      %cst_22 = arith.constant 0.000000e+00 : f32
      %26 = vector.broadcast %cst_22 : f32 to vector<1x1x256xf32>
      %c0_23 = arith.constant 0 : index
      %c0_24 = arith.constant 0 : index
      %c0_25 = arith.constant 0 : index
      %27 = vector.load %arg6[%c0_23, %c0_24, %c0_25] : memref<1x1x256xf32, #tpu.memory_space<vmem>>, vector<1x1x256xf32>
      tpu.vector_store %arg6[%c0_23, %c0_24, %c0_25], %26 {strides = array<i32>} : memref<1x1x256xf32, #tpu.memory_space<vmem>>, vector<1x1x256xf32>,
      %cst_26 = arith.constant 0.000000e+00 : f32
      %28 = vector.broadcast %cst_26 : f32 to vector<1x1x64xf32>
      %c0_27 = arith.constant 0 : index
      %c0_28 = arith.constant 0 : index
      %c0_29 = arith.constant 0 : index
      %29 = vector.load %arg7[%c0_27, %c0_28, %c0_29] : memref<1x1x64xf32, #tpu.memory_space<vmem>>, vector<1x1x64xf32>
      tpu.vector_store %arg7[%c0_27, %c0_28, %c0_29], %28 {strides = array<i32>} : memref<1x1x64xf32, #tpu.memory_space<vmem>>, vector<1x1x64xf32>,
    } else {
    }
    %c0 = arith.constant 0 : index
    %c0_1 = arith.constant 0 : index
    %3 = vector.load %arg2[%c0, %c0_1] : memref<24x256xf32, #tpu.memory_space<vmem>>, vector<24x256xf32>
    %c0_2 = arith.constant 0 : index
    %c0_3 = arith.constant 0 : index
    %4 = vector.load %arg3[%c0_2, %c0_3] : memref<256x384xf32, #tpu.memory_space<vmem>>, vector<256x384xf32>
    %cst = arith.constant dense<0.000000e+00> : vector<24x384xf32>
    %5 = tpu.matmul %3, %4, %cst {dimension_numbers = #tpu.dot_dimension_numbers<[1], [0], [0], [1], [0, 0, 1, 1], [], []>} : vector<24x256xf32>, vector<256x384xf32>, vector<24x384xf32> -> vector<24x384xf32>
    %6 = vector.extract_strided_slice %5 {offsets = [0, 0], sizes = [24, 256], strides = [1, 1]} : vector<24x384xf32> to vector<24x256xf32>
    %c0_4 = arith.constant 0 : index
    %c0_5 = arith.constant 0 : index
    %7 = vector.load %arg4[%c0_4, %c0_5] : memref<24x256xf32, #tpu.memory_space<vmem>>, vector<24x256xf32>
    %8 = arith.subf %6, %7 : vector<24x256xf32>
    %9 = math.absf %8 : vector<24x256xf32>
    %c0_6 = arith.constant 0 : index
    %c0_7 = arith.constant 0 : index
    %c0_8 = arith.constant 0 : index
    %10 = vector.load %arg6[%c0_6, %c0_7, %c0_8] : memref<1x1x256xf32, #tpu.memory_space<vmem>>, vector<1x1x256xf32>
    %cst_9 = arith.constant dense<0.000000e+00> : vector<256xf32>
    %11 = vector.multi_reduction <add>, %9, %cst_9 [0] : vector<24x256xf32> to vector<256xf32>
    %12 = vector.shape_cast %11 : vector<256xf32> to vector<1x256xf32>
    %13 = vector.shape_cast %12 : vector<1x256xf32> to vector<1x1x256xf32>
    %14 = arith.addf %10, %13 : vector<1x1x256xf32>
    %c0_10 = arith.constant 0 : index
    %c0_11 = arith.constant 0 : index
    %c0_12 = arith.constant 0 : index
    %15 = vector.load %arg6[%c0_10, %c0_11, %c0_12] : memref<1x1x256xf32, #tpu.memory_space<vmem>>, vector<1x1x256xf32>
    tpu.vector_store %arg6[%c0_10, %c0_11, %c0_12], %14 {strides = array<i32>} : memref<1x1x256xf32, #tpu.memory_space<vmem>>, vector<1x1x256xf32>,
    %16 = vector.extract_strided_slice %5 {offsets = [0, 256], sizes = [24, 64], strides = [1, 1]} : vector<24x384xf32> to vector<24x64xf32>
    %c0_13 = arith.constant 0 : index
    %c0_14 = arith.constant 0 : index
    %17 = vector.load %arg5[%c0_13, %c0_14] : memref<24x64xf32, #tpu.memory_space<vmem>>, vector<24x64xf32>
    %18 = arith.subf %16, %17 : vector<24x64xf32>
    %19 = math.absf %18 : vector<24x64xf32>
    %c0_15 = arith.constant 0 : index
    %c0_16 = arith.constant 0 : index
    %c0_17 = arith.constant 0 : index
    %20 = vector.load %arg7[%c0_15, %c0_16, %c0_17] : memref<1x1x64xf32, #tpu.memory_space<vmem>>, vector<1x1x64xf32>
    %cst_18 = arith.constant dense<0.000000e+00> : vector<64xf32>
    %21 = vector.multi_reduction <add>, %19, %cst_18 [0] : vector<24x64xf32> to vector<64xf32>
    %22 = vector.shape_cast %21 : vector<64xf32> to vector<1x64xf32>
    %23 = vector.shape_cast %22 : vector<1x64xf32> to vector<1x1x64xf32>
    %24 = arith.addf %20, %23 : vector<1x1x64xf32>
    %c0_19 = arith.constant 0 : index
    %c0_20 = arith.constant 0 : index
    %c0_21 = arith.constant 0 : index
    %25 = vector.load %arg7[%c0_19, %c0_20, %c0_21] : memref<1x1x64xf32, #tpu.memory_space<vmem>>, vector<1x1x64xf32>
    tpu.vector_store %arg7[%c0_19, %c0_20, %c0_21], %24 {strides = array<i32>} : memref<1x1x64xf32, #tpu.memory_space<vmem>>, vector<1x1x64xf32>,
    return
  }
  func.func @transform_0(%arg0: i32, %arg1: i32) -> (i32, i32) {
    %c1_i32 = arith.constant 1 : i32
    %0 = arith.muli %arg0, %c1_i32 : i32
    %1 = arith.addi %0, %arg1 : i32
    %c0_i32 = arith.constant 0 : i32
    %c0_i32_0 = arith.constant 0 : i32
    return %1, %c0_i32 : i32, i32
  }
  func.func @transform_1(%arg0: i32, %arg1: i32) -> (i32, i32) {
    %c0_i32 = arith.constant 0 : i32
    %c0_i32_0 = arith.constant 0 : i32
    %c0_i32_1 = arith.constant 0 : i32
    return %c0_i32, %c0_i32_0 : i32, i32
  }
  func.func @transform_2(%arg0: i32, %arg1: i32) -> (i32, i32) {
    %c1_i32 = arith.constant 1 : i32
    %0 = arith.muli %arg0, %c1_i32 : i32
    %1 = arith.addi %0, %arg1 : i32
    %c0_i32 = arith.constant 0 : i32
    %c0_i32_0 = arith.constant 0 : i32
    return %1, %c0_i32 : i32, i32
  }
  func.func @transform_3(%arg0: i32, %arg1: i32) -> (i32, i32) {
    %c1_i32 = arith.constant 1 : i32
    %0 = arith.muli %arg0, %c1_i32 : i32
    %1 = arith.addi %0, %arg1 : i32
    %c0_i32 = arith.constant 0 : i32
    %c0_i32_0 = arith.constant 0 : i32
    return %1, %c0_i32 : i32, i32
  }
  func.func @transform_4(%arg0: i32, %arg1: i32) -> (i32, i32, i32) {
    %c0_i32 = arith.constant 0 : i32
    %c0_i32_0 = arith.constant 0 : i32
    %c0_i32_1 = arith.constant 0 : i32
    return %arg0, %c0_i32, %c0_i32_0 : i32, i32, i32
  }
  func.func @transform_5(%arg0: i32, %arg1: i32) -> (i32, i32, i32) {
    %c0_i32 = arith.constant 0 : i32
    %c0_i32_0 = arith.constant 0 : i32
    %c0_i32_1 = arith.constant 0 : i32
    return %arg0, %c0_i32, %c0_i32_0 : i32, i32, i32
  }
}

</mosaic_0001>

<bundles_post_ra>
// kernel: _multiscale_l1_loss_impl.1
= control target key start
LH: loop header
LB: loop body
LE: loop exit
PB: predicated region body
PF: predicated region fallthrough
CT: control target
= control target key end

     0   :  { %vm100_vm0 = vcmask 516096   ;;  %vm436_vm2 = vcmask 523264   ;;  %s1011_s1 = inlined_call_operand.vmem [shape: f32[256,384], index: 1, kind: input, shape index: {}]   ;;  %s1012_s0 = inlined_call_operand.vmem [shape: f32[24,256], index: 0, kind: input, shape index: {}]   ;;  %s1013_s5 = inlined_call_operand.vmem [shape: f32[1,1,64], index: 5, kind: output, shape index: {1}]   ;;  %s1014_s4 = inlined_call_operand.vmem [shape: f32[1,1,256], index: 4, kind: output, shape index: {0}]   ;;  %s1015_s3 = inlined_call_operand.vmem [shape: f32[24,64], index: 3, kind: input, shape index: {}]   ;;  %s1016_s2 = inlined_call_operand.vmem [shape: f32[24,256], index: 2, kind: input, shape index: {}]  }
   0x1   :  { %v109_v0 = vld [vmem:[%s1011_s1 + $0x8] sm:$0xff]  ;;  %v112_v1 = vld [vmem:[%s1011_s1 + $0x20] sm:$0xff]  ;;  %v111_v4 = vld [vmem:[%s1011_s1 + $0x18] sm:$0xff] }
   0x2   :  { %v108_v2 = vld [vmem:[%s1011_s1] sm:$0xff]  ;;  %v518_v3 = vpack.c.bf16 %v112_v1, %v109_v0  ;;  %v115_v5 = vld [vmem:[%s1011_s1 + $0x38] sm:$0xff]  ;;  %v118_v6 = vld [vmem:[%s1011_s1 + $0x50] sm:$0xff] }
   0x3   :  { %v520_v7 = vpack.c.bf16 %v111_v4, %v108_v2  ;;  %v522_v8 = vpack.c.bf16 %v118_v6, %v115_v5  ;;  %v114_v9 = vld [vmem:[%s1011_s1 + $0x30] sm:$0xff]  ;;  %v117_v10 = vld [vmem:[%s1011_s1 + $0x48] sm:$0xff]  ;;  %v124_v12 = vld [vmem:[%s1011_s1 + $0x80] sm:$0xff] }
   0x4   :  { %v121_v11 = vld [vmem:[%s1011_s1 + $0x68] sm:$0xff]  ;;  %519 = vmatprep.subr.bf16.mxu0 %v518_v3  ;;  %v524_v13 = vpack.c.bf16 %v117_v10, %v114_v9  ;;  %v120_v15 = vld [vmem:[%s1011_s1 + $0x60] sm:$0xff]  ;;  %v123_v16 = vld [vmem:[%s1011_s1 + $0x78] sm:$0xff] }
   0x5   :  { %521 = vmatpush1.bf16.msra.mxu0 %v520_v7  ;;  %v526_v14 = vpack.c.bf16 %v124_v12, %v121_v11  ;;  %v127_v17 = vld [vmem:[%s1011_s1 + $0x98] sm:$0xff]  ;;  %v130_v18 = vld [vmem:[%s1011_s1 + $0xb0] sm:$0xff]  ;;  %v528_v19 = vpack.c.bf16 %v123_v16, %v120_v15  ;;  %v161_v21 = vld [vmem:[%s1011_s1 + $0x1a8] sm:$0xff] }
   0x6   :  { %523 = vmatprep.subr.bf16.mxu0 %v522_v8  ;;  %v158_v20 = vld [vmem:[%s1011_s1 + $0x190] sm:$0xff]  ;;  %v530_v23 = vpack.c.bf16 %v130_v18, %v127_v17  ;;  %v129_v25 = vld [vmem:[%s1011_s1 + $0xa8] sm:$0xff]  ;;  %v136_v29 = vld [vmem:[%s1011_s1 + $0xe0] sm:$0xff] }
   0x7   :  { %v110_v22 = vld [vmem:[%s1011_s1 + $0x10] sm:$0xff]  ;;  %v582_v26 = vpack.c.bf16 %v161_v21, %v158_v20  ;;  %v113_v27 = vld [vmem:[%s1011_s1 + $0x28] sm:$0xff]  ;;  %v164_v31 = vld [vmem:[%s1011_s1 + $0x1c0] sm:$0xff] }
   0x8   :  { %v126_v24 = vld [vmem:[%s1011_s1 + $0x90] sm:$0xff]  ;;  %v133_v28 = vld [vmem:[%s1011_s1 + $0xc8] sm:$0xff]  ;;  %v584_v30 = vpack.c.bf16 %v113_v27, %v110_v22  ;;  %v167_v32 = vld [vmem:[%s1011_s1 + $0x1d8] sm:$0xff] }
   0x9   :  { %525 = vmatpush1.bf16.msra.mxu0 %v524_v13  ;;  %583 = vmatprep.subr.bf16.mxu1 %v582_v26  ;;  %v116_v33 = vld [vmem:[%s1011_s1 + $0x40] sm:$0xff]  ;;  %v119_v34 = vld [vmem:[%s1011_s1 + $0x58] sm:$0xff]  ;;  %v532_v35 = vpack.c.bf16 %v129_v25, %v126_v24  ;;  %v586_v38 = vpack.c.bf16 %v167_v32, %v164_v31  ;;  %v534_v40 = vpack.c.bf16 %v136_v29, %v133_v28  ;;  %v170_v42 = vld [vmem:[%s1011_s1 + $0x1f0] sm:$0xff] }
   0xa   :  { %527 = vmatprep.subr.bf16.mxu0 %v526_v14  ;;  %v132_v36 = vld [vmem:[%s1011_s1 + $0xc0] sm:$0xff]  ;;  %v135_v37 = vld [vmem:[%s1011_s1 + $0xd8] sm:$0xff]  ;;  %585 = vmatpush3.bf16.msra.mxu1 %v584_v30  ;;  %v588_v39 = vpack.c.bf16 %v119_v34, %v116_v33  ;;  %v173_v43 = vld [vmem:[%s1011_s1 + $0x208] sm:$0xff] }
   0xb   :  { %v139_v41 = vld [vmem:[%s1011_s1 + $0xf8] sm:$0xff]  ;;  %v142_v44 = vld [vmem:[%s1011_s1 + $0x110] sm:$0xff]  ;;  %587 = vmatprep.subr.bf16.mxu1 %v586_v38  ;;  %v590_v45 = vpack.c.bf16 %v173_v43, %v170_v42  ;;  %v125_v47 = vld [vmem:[%s1011_s1 + $0x88] sm:$0xff]  ;;  %v536_v48 = vpack.c.bf16 %v135_v37, %v132_v36 }
   0xc   :  { %v122_v46 = vld [vmem:[%s1011_s1 + $0x70] sm:$0xff]  ;;  %v176_v51 = vld [vmem:[%s1011_s1 + $0x220] sm:$0xff]  ;;  %v179_v52 = vld [vmem:[%s1011_s1 + $0x238] sm:$0xff]  ;;  %v538_v53 = vpack.c.bf16 %v142_v44, %v139_v41 }
   0xd   :  { %529 = vmatpush1.bf16.msra.mxu0 %v528_v19  ;;  %v138_v49 = vld [vmem:[%s1011_s1 + $0xf0] sm:$0xff]  ;;  %v592_v50 = vpack.c.bf16 %v125_v47, %v122_v46  ;;  %v141_v54 = vld [vmem:[%s1011_s1 + $0x108] sm:$0xff]  ;;  %v594_v55 = vpack.c.bf16 %v179_v52, %v176_v51  ;;  %v128_v56 = vld [vmem:[%s1011_s1 + $0xa0] sm:$0xff] }
   0xe   :  { %531 = vmatprep.subr.bf16.mxu0 %v530_v23  ;;  %589 = vmatpush3.bf16.msra.mxu1 %v588_v39  ;;  %v131_v57 = vld [vmem:[%s1011_s1 + $0xb8] sm:$0xff]  ;;  %v145_v58 = vld [vmem:[%s1011_s1 + $0x128] sm:$0xff]  ;;  %v148_v59 = vld [vmem:[%s1011_s1 + $0x140] sm:$0xff]  ;;  %v540_v62 = vpack.c.bf16 %v141_v54, %v138_v49 }
   0xf   :  { %591 = vmatprep.subr.bf16.mxu1 %v590_v45  ;;  %v182_v60 = vld [vmem:[%s1011_s1 + $0x250] sm:$0xff]  ;;  %v185_v61 = vld [vmem:[%s1011_s1 + $0x268] sm:$0xff]  ;;  %v144_v63 = vld [vmem:[%s1011_s1 + $0x120] sm:$0xff]  ;;  %v596_v1 = vpack.c.bf16 %v131_v57, %v128_v56  ;;  %v542_v2 = vpack.c.bf16 %v148_v59, %v145_v58 }
  0x10   :  { %v147_v0 = vld [vmem:[%s1011_s1 + $0x138] sm:$0xff]  ;;  %v598_v4 = vpack.c.bf16 %v185_v61, %v182_v60  ;;  %v134_v5 = vld [vmem:[%s1011_s1 + $0xd0] sm:$0xff]  ;;  %v137_v6 = vld [vmem:[%s1011_s1 + $0xe8] sm:$0xff] }
  0x11   :  { %533 = vmatpush1.bf16.msra.mxu0 %v532_v35  ;;  %v151_v3 = vld [vmem:[%s1011_s1 + $0x158] sm:$0xff]  ;;  %v154_v7 = vld [vmem:[%s1011_s1 + $0x170] sm:$0xff]  ;;  %v188_v8 = vld [vmem:[%s1011_s1 + $0x280] sm:$0xff]  ;;  %v544_v10 = vpack.c.bf16 %v147_v0, %v144_v63  ;;  %v600_v13 = vpack.c.bf16 %v137_v6, %v134_v5 }
  0x12   :  { %535 = vmatprep.subr.bf16.mxu0 %v534_v40  ;;  %593 = vmatpush3.bf16.msra.mxu1 %v592_v50  ;;  %v191_v9 = vld [vmem:[%s1011_s1 + $0x298] sm:$0xff]  ;;  %v150_v11 = vld [vmem:[%s1011_s1 + $0x150] sm:$0xff]  ;;  %v153_v12 = vld [vmem:[%s1011_s1 + $0x168] sm:$0xff]  ;;  %v546_v14 = vpack.c.bf16 %v154_v7, %v151_v3 }
  0x13   :  { %595 = vmatprep.subr.bf16.mxu1 %v594_v55  ;;  %v157_v15 = vld [vmem:[%s1011_s1 + $0x188] sm:$0xff]  ;;  %v602_v16 = vpack.c.bf16 %v191_v9, %v188_v8  ;;  %v140_v17 = vld [vmem:[%s1011_s1 + $0x100] sm:$0xff]  ;;  %v143_v18 = vld [vmem:[%s1011_s1 + $0x118] sm:$0xff]  ;;  %v548_v22 = vpack.c.bf16 %v153_v12, %v150_v11 }
  0x14   :  { %v160_v19 = vld [vmem:[%s1011_s1 + $0x1a0] sm:$0xff]  ;;  %v194_v20 = vld [vmem:[%s1011_s1 + $0x2b0] sm:$0xff]  ;;  %v197_v21 = vld [vmem:[%s1011_s1 + $0x2c8] sm:$0xff]  ;;  %v604_v26 = vpack.c.bf16 %v143_v18, %v140_v17 }
  0x15   :  { %537 = vmatpush1.bf16.msra.mxu0 %v536_v48  ;;  %v156_v23 = vld [vmem:[%s1011_s1 + $0x180] sm:$0xff]  ;;  %v159_v24 = vld [vmem:[%s1011_s1 + $0x198] sm:$0xff]  ;;  %v550_v27 = vpack.c.bf16 %v160_v19, %v157_v15  ;;  %v606_v28 = vpack.c.bf16 %v197_v21, %v194_v20  ;;  %v146_v29 = vld [vmem:[%s1011_s1 + $0x130] sm:$0xff] }
  0x16   :  { %539 = vmatprep.subr.bf16.mxu0 %v538_v53  ;;  %597 = vmatpush3.bf16.msra.mxu1 %v596_v1  ;;  %v163_v25 = vld [vmem:[%s1011_s1 + $0x1b8] sm:$0xff]  ;;  %v149_v30 = vld [vmem:[%s1011_s1 + $0x148] sm:$0xff]  ;;  %v166_v32 = vld [vmem:[%s1011_s1 + $0x1d0] sm:$0xff]  ;;  %v552_v35 = vpack.c.bf16 %v159_v24, %v156_v23  ;;  %v95_v23 = vlaneseq }
  0x17   :  { %599 = vmatprep.subr.bf16.mxu1 %v598_v4  ;;  %v103_v31 = vld [vmem:[%s1012_s0 + $0x8] sm:$0xff]  ;;  %v200_v33 = vld [vmem:[%s1011_s1 + $0x2e0] sm:$0xff]  ;;  %v203_v34 = vld [vmem:[%s1011_s1 + $0x2f8] sm:$0xff]  ;;  %v608_v37 = vpack.c.bf16 %v149_v30, %v146_v29  ;;  %v554_v38 = vpack.c.bf16 %v166_v32, %v163_v25 }
  0x18   :  { %351 = vmatprep.mubr.f32.mxu1 %v103_v31  ;;  %268 = vmatprep.mubr.f32.mxu0 %v103_v31  ;;  %v162_v36 = vld [vmem:[%s1011_s1 + $0x1b0] sm:$0xff]  ;;  %v165_v39 = vld [vmem:[%s1011_s1 + $0x1c8] sm:$0xff]  ;;  %v610_v40 = vpack.c.bf16 %v203_v34, %v200_v33  ;;  %v152_v41 = vld [vmem:[%s1011_s1 + $0x160] sm:$0xff]  ;;  %vm959_vm1 = vcmp.lt.s32.totalorder %v95_v23, 256 }
  0x19   :  { %541 = vmatpush1.bf16.msra.mxu0 %v540_v62  ;;  %v155_v42 = vld [vmem:[%s1011_s1 + $0x178] sm:$0xff]  ;;  %v169_v43 = vld [vmem:[%s1011_s1 + $0x1e8] sm:$0xff]  ;;  %v172_v44 = vld [vmem:[%s1011_s1 + $0x200] sm:$0xff]  ;;  %v556_v45 = vpack.c.bf16 %v165_v39, %v162_v36 }
  0x1a   :  { %543 = vmatprep.subr.bf16.mxu0 %v542_v2  ;;  %601 = vmatpush3.bf16.msra.mxu1 %v600_v13  ;;  %v612_v46 = vpack.c.bf16 %v155_v42, %v152_v41  ;;  %v558_v47 = vpack.c.bf16 %v172_v44, %v169_v43  ;;  %v168_v48 = vld [vmem:[%s1011_s1 + $0x1e0] sm:$0xff]  ;;  %v171_v49 = vld [vmem:[%s1011_s1 + $0x1f8] sm:$0xff]  ;;  %v178_v51 = vld [vmem:[%s1011_s1 + $0x230] sm:$0xff] }
  0x1b   :  { %603 = vmatprep.subr.bf16.mxu1 %v602_v16  ;;  %v175_v50 = vld [vmem:[%s1011_s1 + $0x218] sm:$0xff]  ;;  %v560_v52 = vpack.c.bf16 %v171_v49, %v168_v48  ;;  %v102_v53 = vld [vmem:[%s1012_s0] sm:$0xff]  ;;  %v174_v55 = vld [vmem:[%s1011_s1 + $0x210] sm:$0xff] }
  0x1c   :  { %v562_v54 = vpack.c.bf16 %v178_v51, %v175_v50  ;;  %v177_v56 = vld [vmem:[%s1011_s1 + $0x228] sm:$0xff]  ;;  %v105_v57 = vld [vmem:[%s1012_s0 + $0x18] sm:$0xff]  ;;  %v184_v59 = vld [vmem:[%s1011_s1 + $0x260] sm:$0xff] }
  0x1d   :  { %545 = vmatpush1.bf16.msra.mxu0 %v544_v10  ;;  %v181_v58 = vld [vmem:[%s1011_s1 + $0x248] sm:$0xff]  ;;  %v564_v60 = vpack.c.bf16 %v177_v56, %v174_v55  ;;  %v104_v61 = vld [vmem:[%s1012_s0 + $0x10] sm:$0xff]  ;;  %v180_v63 = vld [vmem:[%s1011_s1 + $0x240] sm:$0xff] }
  0x1e   :  { %547 = vmatprep.subr.bf16.mxu0 %v546_v14  ;;  %605 = vmatpush3.bf16.msra.mxu1 %v604_v26  ;;  %v566_v62 = vpack.c.bf16 %v184_v59, %v181_v58  ;;  %v183_v0 = vld [vmem:[%s1011_s1 + $0x258] sm:$0xff]  ;;  %v107_v1 = vld [vmem:[%s1012_s0 + $0x28] sm:$0xff]  ;;  %v190_v3 = vld [vmem:[%s1011_s1 + $0x290] sm:$0xff] }
  0x1f   :  { %607 = vmatprep.subr.bf16.mxu1 %v606_v28  ;;  %v187_v2 = vld [vmem:[%s1011_s1 + $0x278] sm:$0xff]  ;;  %v568_v4 = vpack.c.bf16 %v183_v0, %v180_v63  ;;  %v106_v5 = vld [vmem:[%s1012_s0 + $0x20] sm:$0xff]  ;;  %v186_v7 = vld [vmem:[%s1011_s1 + $0x270] sm:$0xff] }
  0x20   :  { %v570_v6 = vpack.c.bf16 %v190_v3, %v187_v2  ;;  %v189_v8 = vld [vmem:[%s1011_s1 + $0x288] sm:$0xff]  ;;  %v196_v10 = vld [vmem:[%s1011_s1 + $0x2c0] sm:$0xff]  ;;  %v195_v14 = vld [vmem:[%s1011_s1 + $0x2b8] sm:$0xff] }
  0x21   :  { %549 = vmatpush1.bf16.msra.mxu0 %v548_v22  ;;  %v193_v9 = vld [vmem:[%s1011_s1 + $0x2a8] sm:$0xff]  ;;  %v572_v11 = vpack.c.bf16 %v189_v8, %v186_v7  ;;  %v192_v13 = vld [vmem:[%s1011_s1 + $0x2a0] sm:$0xff]  ;;  %v199_v15 = vld [vmem:[%s1011_s1 + $0x2d8] sm:$0xff]  ;;  %v616_v22 = vmov 0.0  }
  0x22   :  { %551 = vmatprep.subr.bf16.mxu0 %v550_v27  ;;  %609 = vmatpush3.bf16.msra.mxu1 %v608_v37  ;;  %v574_v12 = vpack.c.bf16 %v196_v10, %v193_v9  ;;  %v202_v16 = vld [vmem:[%s1011_s1 + $0x2f0] sm:$0xff]  ;;  %v576_v17 = vpack.c.bf16 %v195_v14, %v192_v13  ;;  %v201_v20 = vld [vmem:[%s1011_s1 + $0x2e8] sm:$0xff]  ;;  %101 = vst.msk [vmem:[%s1013_s5] sm:$0x1] %vm100_vm0, %v616_v22  ;;  %v426_v27 = vld [vmem:[%s1015_s3] sm:$0xff] }
  0x23   :  { %611 = vmatprep.subr.bf16.mxu1 %v610_v40  ;;  %v578_v18 = vpack.c.bf16 %v202_v16, %v199_v15  ;;  %v198_v19 = vld [vmem:[%s1011_s1 + $0x2d0] sm:$0xff]  ;;  %99 = vst.msk [vmem:[%s1014_s4] sm:$0x3] %vm959_vm1, %v616_v22  ;;  %v427_v32 = vld [vmem:[%s1015_s3 + $0x8] sm:$0xff]  ;;  %v370_v59 = vld [vmem:[%s1016_s2 + $0x18] sm:$0xff] }
  0x24   :  { %v580_v21 = vpack.c.bf16 %v201_v20, %v198_v19  ;;  %v368_v55 = vld [vmem:[%s1016_s2 + $0x8] sm:$0xff]  ;;  %v369_v56 = vld [vmem:[%s1016_s2 + $0x10] sm:$0xff]  ;;  %v371_v3 = vld [vmem:[%s1016_s2 + $0x20] sm:$0xff] }
  0x25   :  { %553 = vmatpush1.bf16.msra.mxu0 %v552_v35  ;;  %v372_v7 = vld [vmem:[%s1016_s2 + $0x28] sm:$0xff] }
  0x26   :  { %555 = vmatprep.subr.bf16.mxu0 %v554_v38  ;;  %613 = vmatpush3.bf16.msra.mxu1 %v612_v46  ;;  %v428_v38 = vld [vmem:[%s1015_s3 + $0x10] sm:$0xff] }
  0x29   :  { %557 = vmatpush1.bf16.msra.mxu0 %v556_v45  ;;  %352 = vmatmul.mubr.f32.vlgmr.msra.gmra.mrb[0].mxu1 %v102_v53 }
  0x2a   :  { %559 = vmatprep.subr.bf16.mxu0 %v558_v47  ;;  %356 = vmatprep.mubr.f32.mxu1 %v105_v57 }
  0x2d   :  { %561 = vmatpush1.bf16.msra.mxu0 %v560_v52  ;;  %357 = vmatmul.mubr.f32.gmra.mrb[2].mxu1 %v104_v61  ;;  %v367_v52 = vld [vmem:[%s1016_s2] sm:$0xff] }
  0x2e   :  { %563 = vmatprep.subr.bf16.mxu0 %v562_v54  ;;  %361 = vmatprep.mubr.f32.mxu1 %v107_v1 }
  0x31   :  { %565 = vmatpush1.bf16.msra.mxu0 %v564_v60  ;;  %362 = vmatmul.mubr.f32.gmra.mrb[4].mxu1 %v106_v5  ;;  %v435_v60 = vld [vmem:[%s1013_s5] sm:$0x1] }
  0x32   :  { %567 = vmatprep.subr.bf16.mxu0 %v566_v62 }
  0x35   :  { %569 = vmatpush1.bf16.msra.mxu0 %v568_v4 }
  0x36   :  { %571 = vmatprep.subr.bf16.mxu0 %v570_v6 }
  0x39   :  { %573 = vmatpush1.bf16.msra.mxu0 %v572_v11 }
  0x3a   :  { %575 = vmatprep.subr.bf16.mxu0 %v574_v12 }
  0x3d   :  { %577 = vmatpush1.bf16.msra.mxu0 %v576_v17 }
  0x3e   :  { %579 = vmatprep.subr.bf16.mxu0 %v578_v18 }
  0x41   :  { %581 = vmatpush1.bf16.msra.mxu0 %v580_v21 }
  0x44   :  { %269 = vmatmul.mubr.f32.vlgmr.msra.gmra.mrb[0].mxu0 %v102_v53 }
  0x45   :  { %274 = vmatprep.mubr.f32.mxu0 %v105_v57 }
  0x48   :  { %275 = vmatmul.mubr.f32.gmra.mrb[2].mxu0 %v104_v61 }
  0x49   :  { %280 = vmatprep.mubr.f32.mxu0 %v107_v1 }
  0x4c   :  { %281 = vmatmul.mubr.f32.gmra.mrb[4].mxu0 %v106_v5 }
  0xfc   :  { %v509_v25 = vpop.f32.mrb[0].mxu1 }
  0xfd   :  { %v510_v26 = vpop.f32.mrb[1].mxu1 }
  0xfe   :  { %v511_v28 = vadd.f32 %v510_v26, %v509_v25  ;;  %v617_v26 = vmov 1966171168  }
 0x100   :  { %v429_v29 = vsub.f32 %v511_v28, %v426_v27  ;;  %v512_v30 = vpop.f32.mrb[2].mxu1  ;;  %v406_v27 = vunpack.c.l.s4 %v617_v26 }
 0x101   :  { %v513_v31 = vpop.f32.mrb[3].mxu1 }
 0x102   :  { %v432_v33 = vand.u32 2147483647, %v429_v29  ;;  %v514_v34 = vadd.f32 %v513_v31, %v512_v30 }
 0x104   :  { %v430_v35 = vsub.f32 %v514_v34, %v427_v32  ;;  %v515_v36 = vpop.f32.mrb[4].mxu1  ;;  %v437_v39 = vsel %vm436_vm2, %v432_v33, 0.0  ;;  %v407_v32 = vunpack.c.0.s8 %v406_v27  ;;  %v409_v33 = vshrl.u32 %v95_v23, 7 }
 0x105   :  { %v516_v37 = vpop.f32.mrb[5].mxu1 }
 0x106   :  { %v433_v40 = vand.u32 2147483647, %v430_v35  ;;  %v517_v41 = vadd.f32 %v516_v37, %v515_v36 }
 0x108   :  { %v438_v42 = vsel %vm436_vm2, %v433_v40, 0.0  ;;  %v431_v43 = vsub.f32 %v517_v41, %v428_v38  ;;  %v410_v38 = vsub.s32 %v407_v32, %v409_v33  ;;  %v385_v41 = vld [vmem:[%s1014_s4] sm:$0x3] }
 0x109   :  { %v439_v44 = vadd.f32 %v438_v42, %v437_v39 }
 0x10a   :  { %v434_v45 = vand.u32 2147483647, %v431_v43 }
 0x10c   :  { %v440_v46 = vsel %vm436_vm2, %v434_v45, 0.0 }
 0x10d   :  { %v441_v47 = vadd.f32 %v440_v46, %v439_v44 }
 0x10f   :  { %v442_v48 = vrot.slane %v441_v47, 4 }
 0x111   :  { %v443_v49 = vadd.f32 %v442_v48, %v441_v47 }
 0x113   :  { %v444_v50 = vrot.slane %v443_v49, 2 }
 0x115   :  { %v445_v53 = vadd.f32 %v444_v50, %v443_v49 }
 0x117   :  { %v270_v51 = vpop.f32.mrb[0].mxu0  ;;  %v446_v57 = vrot.slane %v445_v53, 1 }
 0x118   :  { %v272_v54 = vpop.f32.mrb[1].mxu0  ;;  %v373_v58 = vsub.f32 %v270_v51, %v367_v52 }
 0x119   :  { %v374_v61 = vsub.f32 %v272_v54, %v368_v55  ;;  %v447_v63 = vadd.f32 %v446_v57, %v445_v53 }
 0x11a   :  { %v379_v5 = vand.u32 2147483647, %v373_v58 }
 0x11b   :  { %v276_v62 = vpop.f32.mrb[2].mxu0  ;;  %v448_v4 = vadd.f32 %v447_v63, %v435_v60  ;;  %v380_v8 = vand.u32 2147483647, %v374_v61 }
 0x11c   :  { %v375_v0 = vsub.f32 %v276_v62, %v369_v56  ;;  %v278_v1 = vpop.f32.mrb[3].mxu0 }
 0x11d   :  { %v376_v2 = vsub.f32 %v278_v1, %v370_v59  ;;  %450 = vst.msk [vmem:[%s1013_s5] sm:$0x1] %vm100_vm0, %v448_v4 }
 0x11e   :  { %v381_v6 = vand.u32 2147483647, %v375_v0 }
 0x11f   :  { %v382_v9 = vand.u32 2147483647, %v376_v2  ;;  %v282_v10 = vpop.f32.mrb[4].mxu0 }
 0x120   :  { %v386_v11 = vadd.f32 %v381_v6, %v379_v5  ;;  %v377_v12 = vsub.f32 %v282_v10, %v371_v3  ;;  %v284_v13 = vpop.f32.mrb[5].mxu0 }
 0x121   :  { %v394_v14 = vadd.f32 %v382_v9, %v380_v8  ;;  %v378_v15 = vsub.f32 %v284_v13, %v372_v7 }
 0x122   :  { %v383_v16 = vand.u32 2147483647, %v377_v12 }
 0x123   :  { %v384_v17 = vand.u32 2147483647, %v378_v15 }
 0x124   :  { %v387_v18 = vadd.f32 %v386_v11, %v383_v16 }
 0x125   :  { %v395_v19 = vadd.f32 %v394_v14, %v384_v17 }
 0x126   :  { %v388_v20 = vrot.slane %v387_v18, 4 }
 0x127   :  { %v396_v21 = vrot.slane %v395_v19, 4 }
 0x128   :  { %v389_v22 = vadd.f32 %v388_v20, %v387_v18 }
 0x129   :  { %v397_v25 = vadd.f32 %v396_v21, %v395_v19 }
 0x12a   :  { %v390_v28 = vrot.slane %v389_v22, 2 }
 0x12b   :  { %v398_v29 = vrot.slane %v397_v25, 2 }
 0x12c   :  { %v391_v30 = vadd.f32 %v390_v28, %v389_v22 }
 0x12d   :  { %v399_v31 = vadd.f32 %v398_v29, %v397_v25 }
 0x12e   :  { %v392_v34 = vrot.slane %v391_v30, 1 }
 0x12f   :  { %v400_v35 = vrot.slane %v399_v31, 1 }
 0x130   :  { %v393_v36 = vadd.f32 %v392_v34, %v391_v30 }
 0x131   :  { %v401_v37 = vadd.f32 %v400_v35, %v399_v31 }
 0x133   :  { %v404_v39 = vcombine.low %v393_v36, %v401_v37 }
 0x135   :  { %v411_v40 = vrot.slane %v404_v39, %v410_v38 }
 0x137   :  { %v418_v42 = vrot.slane %v411_v40, %v410_v38 }
 0x139   :  { %v420_v43 = vadd.f32 %v418_v42, %v385_v41 }
 0x13b   :  { %425 = vst.msk [vmem:[%s1014_s4] sm:$0x3] %vm959_vm1, %v420_v43 }

</bundles_post_ra>
